<compile_context>
chip_gen: v6e
topology: v6e:2x2x1
jax: 0.10.0
libtpu: 0.0.40
codegen_flags: <defaults>
</compile_context>

<pallas_src>
import jax
import jax.numpy as jnp
from jax.experimental import pallas as pl
from jax.experimental.pallas import tpu as pltpu


def actor_kernel(x_ref, w_ref, out_ref):
    """Fused Actor forward.

    x_ref  : [B, S]     f32  (raw state)
    w_ref  : [3, H, H]  bf16 packed slab:
               slab 0 rows [0:S)      = folded W1 (state_size -> H, zero-padded cols)
               slab 0 rows [H-3:H)    = folded biases b1, b2, b3 (zero-padded cols)
               slab 1                 = folded W2 (zero-padded)
               slab 2                 = folded W3 (zero-padded)
    out_ref: [B, H]     f32  lane-dense (real action_size columns, rest zero-ish)
    """
    eps = jnp.float32(1e-5)
    S = x_ref.shape[1]
    H = w_ref.shape[-1]

    def normalize(h):
        # Single reduction pass: mean and mean-of-squares are independent.
        mu = jnp.mean(h, axis=0, keepdims=True)
        m2 = jnp.mean(h * h, axis=0, keepdims=True)
        var = jnp.maximum(m2 - mu * mu, 0.0)
        return (h - mu) * jax.lax.rsqrt(var + eps)

    slab0 = w_ref[0]                       # [H, H] bf16 (VMEM-resident)
    w1 = slab0[:S, :]                      # [S, H] bf16
    b = slab0[H - 3:, :].astype(jnp.float32)   # [3, H] folded biases

    x = x_ref[...].astype(jnp.float32)

    # Block 1: BN(state) -> Linear -> ReLU
    h = normalize(x)
    h = jnp.dot(h.astype(jnp.bfloat16), w1,
                preferred_element_type=jnp.float32) + b[0:1, :]
    h = jnp.maximum(h, 0.0)

    # Block 2: BN -> Linear -> ReLU (padded cols stay exactly 0 through BN)
    h = normalize(h)
    h = jnp.dot(h.astype(jnp.bfloat16), w_ref[1],
                preferred_element_type=jnp.float32) + b[1:2, :]
    h = jnp.maximum(h, 0.0)

    # Block 3: BN -> Linear -> Tanh (lane-dense [B, H] store)
    h = normalize(h)
    h = jnp.dot(h.astype(jnp.bfloat16), w_ref[2],
                preferred_element_type=jnp.float32) + b[2:3, :]
    out_ref[...] = jnp.tanh(h).astype(out_ref.dtype)


def fold_and_pack(params, *, lane=128):
    """Offline parameter prep (all folding in f32, single bf16 cast at the end):
       - fold BN gamma/beta into the following Linear:
           (x_hat*g + be) @ W + b == x_hat @ (diag(g)W) + (be@W + b)
       - zero-pad widths to a common lane-dense H,
       - pack W1/W2/W3 into one [3, H, H] slab, stashing the 3 bias rows in the
         unused zero rows H-3..H-1 of the W1 slab."""
    def rup(n, m):
        return ((n + m - 1) // m) * m

    S = params["w1"].shape[0]
    n0 = params["w1"].shape[1]
    n1 = params["w2"].shape[1]
    A = params["w3"].shape[1]
    H = max(rup(n0, lane), rup(n1, lane), rup(A, lane), rup(S + 3, lane))
    assert S <= H - 3, "state rows must not collide with the stashed bias rows"

    def fold(g, be, w, bias):
        wf = g.reshape(-1, 1) * w                           # diag(g) @ W   ([in,out])
        bf = be.reshape(1, -1) @ w + bias.reshape(1, -1)    # be @ W + b
        return wf.astype(jnp.float32), bf.astype(jnp.float32)

    w1f, b1f = fold(params["g1"], params["be1"], params["w1"], params["b1"])
    w2f, b2f = fold(params["g2"], params["be2"], params["w2"], params["b2"])
    w3f, b3f = fold(params["g3"], params["be3"], params["w3"], params["b3"])

    def pad_w(w):
        return jnp.zeros((H, H), jnp.float32).at[: w.shape[0], : w.shape[1]].set(w)

    def pad_b(bv):
        return jnp.zeros((H,), jnp.float32).at[: bv.shape[-1]].set(bv.reshape(-1))

    slab0 = pad_w(w1f)
    slab0 = slab0.at[H - 3].set(pad_b(b1f))
    slab0 = slab0.at[H - 2].set(pad_b(b2f))
    slab0 = slab0.at[H - 1].set(pad_b(b3f))

    wslab_f32 = jnp.stack([slab0, pad_w(w2f), pad_w(w3f)])   # [3, H, H] f32
    wslab = wslab_f32.astype(jnp.bfloat16)                   # single cast after f32 fold

    # Zero-pad invariant: padded output columns must be exactly 0 so BN keeps
    # them 0 in the following block (0 in f32 stays 0 in bf16).
    assert bool(jnp.all(wslab[0, :S, n0:] == 0))
    assert bool(jnp.all(wslab[0, H - 3, n0:] == 0))
    assert bool(jnp.all(wslab[1, :, n1:] == 0))
    assert bool(jnp.all(wslab[0, H - 2, n1:] == 0))
    assert bool(jnp.all(wslab[2, :, A:] == 0))
    assert bool(jnp.all(wslab[0, H - 1, A:] == 0))

    return {"wslab": wslab, "H": H, "A": A, "S": S, "n0": n0, "n1": n1}


def actor_forward(state, packed):
    """state: [B, state_size] f32. packed: output of fold_and_pack().
    Returns the lane-dense [B, H] output; crop [:, :action_size] under the
    consumer's jit so it fuses into the same dispatch."""
    B, S = state.shape
    H = packed["H"]
    wslab = packed["wslab"]

    vmem = pl.BlockSpec(memory_space=pltpu.MemorySpace.VMEM)
    flops = int(2 * B * (S * H + 2 * H * H) + 12 * B * H)
    transcendentals = int(B * H + 3 * H)            # tanh + 3x rsqrt rows
    bytes_accessed = int(4 * state.size + 2 * wslab.size + 4 * B * H)  # bf16 weights

    return pl.pallas_call(
        actor_kernel,
        out_shape=jax.ShapeDtypeStruct((B, H), jnp.float32),
        grid=(),  # tiny problem: single invocation, everything resident in VMEM
        in_specs=[vmem, vmem],
        out_specs=vmem,
        cost_estimate=pl.CostEstimate(
            flops=flops,
            transcendentals=transcendentals,
            bytes_accessed=bytes_accessed,
        ),
    )(state, wslab)


def make_params(key, state_size, action_size, nodes=(32, 32)):
    """Deterministic parameter init mirroring Actor.__init__ / init_weights:
       xavier_uniform_ weights, bias = 0.1, BN gamma=1, beta=0."""
    def xavier(k, fan_in, fan_out):
        bound = jnp.sqrt(6.0 / (fan_in + fan_out))
        # stored [in, out] (transpose of PyTorch's [out, in]) for h @ W
        return jax.random.uniform(k, (fan_in, fan_out), jnp.float32, -bound, bound)

    k1, k2, k3 = jax.random.split(key, 3)
    n0, n1 = nodes
    return {
        "g1": jnp.ones((1, state_size), jnp.float32),
        "be1": jnp.zeros((1, state_size), jnp.float32),
        "w1": xavier(k1, state_size, n0),
        "b1": jnp.full((1, n0), 0.1, jnp.float32),
        "g2": jnp.ones((1, n0), jnp.float32),
        "be2": jnp.zeros((1, n0), jnp.float32),
        "w2": xavier(k2, n0, n1),
        "b2": jnp.full((1, n1), 0.1, jnp.float32),
        "g3": jnp.ones((1, n1), jnp.float32),
        "be3": jnp.zeros((1, n1), jnp.float32),
        "w3": xavier(k3, n1, action_size),
        "b3": jnp.full((1, action_size), 0.1, jnp.float32),
    }


def actor_reference(state, params):
    """Pure-JAX f32 reference of the original (unfolded) PyTorch math."""
    eps = 1e-5

    def bn(h, g, be):
        mu = jnp.mean(h, axis=0, keepdims=True)
        var = jnp.mean((h - mu) ** 2, axis=0, keepdims=True)
        return (h - mu) / jnp.sqrt(var + eps) * g + be

    h = bn(state, params["g1"], params["be1"])
    h = jnp.maximum(h @ params["w1"] + params["b1"], 0.0)
    h = bn(h, params["g2"], params["be2"])
    h = jnp.maximum(h @ params["w2"] + params["b2"], 0.0)
    h = bn(h, params["g3"], params["be3"])
    return jnp.tanh(h @ params["w3"] + params["b3"])


def actor_reference_packed(state, packed):
    """Pure-JAX reference using the SAME packed bf16 slab and cast-at-the-dot
    pattern as the kernel — isolates Pallas-kernel correctness from bf16
    quantization error."""
    eps = jnp.float32(1e-5)
    H, S = packed["H"], packed["S"]
    wslab = packed["wslab"]
    slab0 = wslab[0]
    w1 = slab0[:S, :]
    b = slab0[H - 3:, :].astype(jnp.float32)

    def bn(h):
        mu = jnp.mean(h, axis=0, keepdims=True)
        m2 = jnp.mean(h * h, axis=0, keepdims=True)
        var = jnp.maximum(m2 - mu * mu, 0.0)
        return (h - mu) * jax.lax.rsqrt(var + eps)

    h = bn(state.astype(jnp.float32))
    h = jnp.maximum(jnp.dot(h.astype(jnp.bfloat16), w1,
                            preferred_element_type=jnp.float32) + b[0:1], 0.0)
    h = bn(h)
    h = jnp.maximum(jnp.dot(h.astype(jnp.bfloat16), wslab[1],
                            preferred_element_type=jnp.float32) + b[1:2], 0.0)
    h = bn(h)
    h = jnp.dot(h.astype(jnp.bfloat16), wslab[2],
                preferred_element_type=jnp.float32) + b[2:3]
    return jnp.tanh(h)


if __name__ == "__main__":
    key = jax.random.PRNGKey(0)
    k_state, k_params, k_affine, k_big = jax.random.split(key, 4)

    batch = 8
    state_size = 16
    action_size = 4
    nodes = (32, 32)

    state = jax.random.normal(k_state, (batch, state_size), jnp.float32)

    # 1) Faithful PyTorch init (BN gamma=1, beta=0, xavier weights, bias=0.1).
    params = make_params(k_params, state_size, action_size, nodes)
    packed = fold_and_pack(params)
    A = packed["A"]

    # Crop to action_size happens inside the same jit -> fuses with the call.
    fwd = jax.jit(lambda s: actor_forward(s, packed)[:, :A])

    out = jax.block_until_ready(fwd(state))
    assert out.shape == (batch, action_size)

    # Tight check vs. a reference using the identical packed bf16 slab.
    ref_packed = actor_reference_packed(state, packed)[:, :A]
    assert jnp.allclose(out, ref_packed, atol=1e-4, rtol=1e-4), "kernel != packed ref"

    # Loose sanity check vs. the original f32 unfolded math (bf16 weight budget).
    ref_f32 = actor_reference(state, params)
    assert jnp.allclose(out, ref_f32, atol=5e-2, rtol=5e-2), "kernel far from f32 ref"

    # 2) Non-trivial BN affine params exercise the fold-into-weights path.
    ks = jax.random.split(k_affine, 6)
    params2 = dict(params)
    params2["g1"] = 1.0 + 0.1 * jax.random.normal(ks[0], params["g1"].shape, jnp.float32)
    params2["be1"] = 0.1 * jax.random.normal(ks[1], params["be1"].shape, jnp.float32)
    params2["g2"] = 1.0 + 0.1 * jax.random.normal(ks[2], params["g2"].shape, jnp.float32)
    params2["be2"] = 0.1 * jax.random.normal(ks[3], params["be2"].shape, jnp.float32)
    params2["g3"] = 1.0 + 0.1 * jax.random.normal(ks[4], params["g3"].shape, jnp.float32)
    params2["be3"] = 0.1 * jax.random.normal(ks[5], params["be3"].shape, jnp.float32)
    packed2 = fold_and_pack(params2)
    fwd2 = jax.jit(lambda s: actor_forward(s, packed2)[:, :A])
    out2 = jax.block_until_ready(fwd2(state))
    ref2_packed = actor_reference_packed(state, packed2)[:, :A]
    ref2_f32 = actor_reference(state, params2)
    assert jnp.allclose(out2, ref2_packed, atol=1e-4, rtol=1e-4), "mismatch (folded affine)"
    assert jnp.allclose(out2, ref2_f32, atol=5e-2, rtol=5e-2), "far from f32 ref (affine)"

    # 3) Larger stacked batch (amortizes launch cost, fills MXU rows) — the
    #    kernel body is batch-agnostic; BN stats are over the full batch.
    big_state = jax.random.normal(k_big, (128, state_size), jnp.float32)
    fwd_big = jax.jit(lambda s: actor_forward(s, packed)[:, :A])
    out_big = jax.block_until_ready(fwd_big(big_state))
    ref_big = actor_reference_packed(big_state, packed)[:, :A]
    assert out_big.shape == (128, action_size)
    assert jnp.allclose(out_big, ref_big, atol=1e-4, rtol=1e-4), "mismatch (B=128)"

    print("KERNEL_OK")
</pallas_src>

<mosaic_0001>
module attributes {stable_mosaic.version = 11 : i64} {
  func.func @actor_kernel(%arg0: memref<8x16xf32, #tpu.memory_space<vmem>>, %arg1: memref<3x128x128xbf16, #tpu.memory_space<vmem>>, %arg2: memref<8x128xf32, #tpu.memory_space<vmem>>) attributes {dimension_semantics = [], scalar_prefetch = 0 : i64, scratch_operands = 0 : i64, tpu.core_type = #tpu.core_type<tc>} {
    %c0 = arith.constant 0 : index
    %c0_0 = arith.constant 0 : index
    %c0_1 = arith.constant 0 : index
    %0 = vector.load %arg1[%c0, %c0_0, %c0_1] : memref<3x128x128xbf16, #tpu.memory_space<vmem>>, vector<1x128x128xbf16>
    %1 = vector.shape_cast %0 : vector<1x128x128xbf16> to vector<128x128xbf16>
    %2 = vector.extract_strided_slice %1 {offsets = [0, 0], sizes = [16, 128], strides = [1, 1]} : vector<128x128xbf16> to vector<16x128xbf16>
    %3 = vector.extract_strided_slice %1 {offsets = [125, 0], sizes = [3, 128], strides = [1, 1]} : vector<128x128xbf16> to vector<3x128xbf16>
    %4 = arith.extf %3 : vector<3x128xbf16> to vector<3x128xf32>
    %c0_2 = arith.constant 0 : index
    %c0_3 = arith.constant 0 : index
    %5 = vector.load %arg0[%c0_2, %c0_3] : memref<8x16xf32, #tpu.memory_space<vmem>>, vector<8x16xf32>
    %cst = arith.constant dense<0.000000e+00> : vector<16xf32>
    %6 = vector.multi_reduction <add>, %5, %cst [0] : vector<8x16xf32> to vector<16xf32>
    %7 = vector.shape_cast %6 : vector<16xf32> to vector<1x16xf32>
    %cst_4 = arith.constant 8.000000e+00 : f32
    %8 = vector.broadcast %cst_4 : f32 to vector<1x16xf32>
    %9 = arith.divf %7, %8 : vector<1x16xf32>
    %10 = arith.mulf %5, %5 : vector<8x16xf32>
    %cst_5 = arith.constant dense<0.000000e+00> : vector<16xf32>
    %11 = vector.multi_reduction <add>, %10, %cst_5 [0] : vector<8x16xf32> to vector<16xf32>
    %12 = vector.shape_cast %11 : vector<16xf32> to vector<1x16xf32>
    %cst_6 = arith.constant 8.000000e+00 : f32
    %13 = vector.broadcast %cst_6 : f32 to vector<1x16xf32>
    %14 = arith.divf %12, %13 : vector<1x16xf32>
    %15 = arith.mulf %9, %9 : vector<1x16xf32>
    %16 = arith.subf %14, %15 : vector<1x16xf32>
    %cst_7 = arith.constant 0.000000e+00 : f32
    %17 = vector.broadcast %cst_7 : f32 to vector<1x16xf32>
    %18 = arith.maximumf %16, %17 : vector<1x16xf32>
    %19 = vector.broadcast %9 : vector<1x16xf32> to vector<8x16xf32>
    %20 = arith.subf %5, %19 : vector<8x16xf32>
    %cst_8 = arith.constant 9.99999974E-6 : f32
    %21 = vector.broadcast %cst_8 : f32 to vector<1x16xf32>
    %22 = arith.addf %18, %21 : vector<1x16xf32>
    %23 = math.rsqrt %22 : vector<1x16xf32>
    %24 = vector.broadcast %23 : vector<1x16xf32> to vector<8x16xf32>
    %25 = arith.mulf %20, %24 : vector<8x16xf32>
    %26 = arith.truncf %25 : vector<8x16xf32> to vector<8x16xbf16>
    %cst_9 = arith.constant dense<0.000000e+00> : vector<8x128xf32>
    %27 = tpu.matmul %26, %2, %cst_9 {dimension_numbers = #tpu.dot_dimension_numbers<[1], [0], [0], [1], [0, 0, 1, 1], [], []>} : vector<8x16xbf16>, vector<16x128xbf16>, vector<8x128xf32> -> vector<8x128xf32>
    %28 = vector.extract_strided_slice %4 {offsets = [0, 0], sizes = [1, 128], strides = [1, 1]} : vector<3x128xf32> to vector<1x128xf32>
    %29 = vector.broadcast %28 : vector<1x128xf32> to vector<8x128xf32>
    %30 = arith.addf %27, %29 : vector<8x128xf32>
    %cst_10 = arith.constant 0.000000e+00 : f32
    %31 = vector.broadcast %cst_10 : f32 to vector<8x128xf32>
    %32 = arith.maximumf %30, %31 : vector<8x128xf32>
    %cst_11 = arith.constant dense<0.000000e+00> : vector<128xf32>
    %33 = vector.multi_reduction <add>, %32, %cst_11 [0] : vector<8x128xf32> to vector<128xf32>
    %34 = vector.shape_cast %33 : vector<128xf32> to vector<1x128xf32>
    %cst_12 = arith.constant 8.000000e+00 : f32
    %35 = vector.broadcast %cst_12 : f32 to vector<1x128xf32>
    %36 = arith.divf %34, %35 : vector<1x128xf32>
    %37 = arith.mulf %32, %32 : vector<8x128xf32>
    %cst_13 = arith.constant dense<0.000000e+00> : vector<128xf32>
    %38 = vector.multi_reduction <add>, %37, %cst_13 [0] : vector<8x128xf32> to vector<128xf32>
    %39 = vector.shape_cast %38 : vector<128xf32> to vector<1x128xf32>
    %cst_14 = arith.constant 8.000000e+00 : f32
    %40 = vector.broadcast %cst_14 : f32 to vector<1x128xf32>
    %41 = arith.divf %39, %40 : vector<1x128xf32>
    %42 = arith.mulf %36, %36 : vector<1x128xf32>
    %43 = arith.subf %41, %42 : vector<1x128xf32>
    %cst_15 = arith.constant 0.000000e+00 : f32
    %44 = vector.broadcast %cst_15 : f32 to vector<1x128xf32>
    %45 = arith.maximumf %43, %44 : vector<1x128xf32>
    %46 = vector.broadcast %36 : vector<1x128xf32> to vector<8x128xf32>
    %47 = arith.subf %32, %46 : vector<8x128xf32>
    %cst_16 = arith.constant 9.99999974E-6 : f32
    %48 = vector.broadcast %cst_16 : f32 to vector<1x128xf32>
    %49 = arith.addf %45, %48 : vector<1x128xf32>
    %50 = math.rsqrt %49 : vector<1x128xf32>
    %51 = vector.broadcast %50 : vector<1x128xf32> to vector<8x128xf32>
    %52 = arith.mulf %47, %51 : vector<8x128xf32>
    %53 = arith.truncf %52 : vector<8x128xf32> to vector<8x128xbf16>
    %c1 = arith.constant 1 : index
    %c0_17 = arith.constant 0 : index
    %c0_18 = arith.constant 0 : index
    %54 = vector.load %arg1[%c1, %c0_17, %c0_18] : memref<3x128x128xbf16, #tpu.memory_space<vmem>>, vector<1x128x128xbf16>
    %55 = vector.shape_cast %54 : vector<1x128x128xbf16> to vector<128x128xbf16>
    %cst_19 = arith.constant dense<0.000000e+00> : vector<8x128xf32>
    %56 = tpu.matmul %53, %55, %cst_19 {dimension_numbers = #tpu.dot_dimension_numbers<[1], [0], [0], [1], [0, 0, 1, 1], [], []>} : vector<8x128xbf16>, vector<128x128xbf16>, vector<8x128xf32> -> vector<8x128xf32>
    %57 = vector.extract_strided_slice %4 {offsets = [1, 0], sizes = [1, 128], strides = [1, 1]} : vector<3x128xf32> to vector<1x128xf32>
    %58 = vector.broadcast %57 : vector<1x128xf32> to vector<8x128xf32>
    %59 = arith.addf %56, %58 : vector<8x128xf32>
    %cst_20 = arith.constant 0.000000e+00 : f32
    %60 = vector.broadcast %cst_20 : f32 to vector<8x128xf32>
    %61 = arith.maximumf %59, %60 : vector<8x128xf32>
    %cst_21 = arith.constant dense<0.000000e+00> : vector<128xf32>
    %62 = vector.multi_reduction <add>, %61, %cst_21 [0] : vector<8x128xf32> to vector<128xf32>
    %63 = vector.shape_cast %62 : vector<128xf32> to vector<1x128xf32>
    %cst_22 = arith.constant 8.000000e+00 : f32
    %64 = vector.broadcast %cst_22 : f32 to vector<1x128xf32>
    %65 = arith.divf %63, %64 : vector<1x128xf32>
    %66 = arith.mulf %61, %61 : vector<8x128xf32>
    %cst_23 = arith.constant dense<0.000000e+00> : vector<128xf32>
    %67 = vector.multi_reduction <add>, %66, %cst_23 [0] : vector<8x128xf32> to vector<128xf32>
    %68 = vector.shape_cast %67 : vector<128xf32> to vector<1x128xf32>
    %cst_24 = arith.constant 8.000000e+00 : f32
    %69 = vector.broadcast %cst_24 : f32 to vector<1x128xf32>
    %70 = arith.divf %68, %69 : vector<1x128xf32>
    %71 = arith.mulf %65, %65 : vector<1x128xf32>
    %72 = arith.subf %70, %71 : vector<1x128xf32>
    %cst_25 = arith.constant 0.000000e+00 : f32
    %73 = vector.broadcast %cst_25 : f32 to vector<1x128xf32>
    %74 = arith.maximumf %72, %73 : vector<1x128xf32>
    %75 = vector.broadcast %65 : vector<1x128xf32> to vector<8x128xf32>
    %76 = arith.subf %61, %75 : vector<8x128xf32>
    %cst_26 = arith.constant 9.99999974E-6 : f32
    %77 = vector.broadcast %cst_26 : f32 to vector<1x128xf32>
    %78 = arith.addf %74, %77 : vector<1x128xf32>
    %79 = math.rsqrt %78 : vector<1x128xf32>
    %80 = vector.broadcast %79 : vector<1x128xf32> to vector<8x128xf32>
    %81 = arith.mulf %76, %80 : vector<8x128xf32>
    %82 = arith.truncf %81 : vector<8x128xf32> to vector<8x128xbf16>
    %c2 = arith.constant 2 : index
    %c0_27 = arith.constant 0 : index
    %c0_28 = arith.constant 0 : index
    %83 = vector.load %arg1[%c2, %c0_27, %c0_28] : memref<3x128x128xbf16, #tpu.memory_space<vmem>>, vector<1x128x128xbf16>
    %84 = vector.shape_cast %83 : vector<1x128x128xbf16> to vector<128x128xbf16>
    %cst_29 = arith.constant dense<0.000000e+00> : vector<8x128xf32>
    %85 = tpu.matmul %82, %84, %cst_29 {dimension_numbers = #tpu.dot_dimension_numbers<[1], [0], [0], [1], [0, 0, 1, 1], [], []>} : vector<8x128xbf16>, vector<128x128xbf16>, vector<8x128xf32> -> vector<8x128xf32>
    %86 = vector.extract_strided_slice %4 {offsets = [2, 0], sizes = [1, 128], strides = [1, 1]} : vector<3x128xf32> to vector<1x128xf32>
    %87 = vector.broadcast %86 : vector<1x128xf32> to vector<8x128xf32>
    %88 = arith.addf %85, %87 : vector<8x128xf32>
    %89 = math.tanh %88 : vector<8x128xf32>
    %c0_30 = arith.constant 0 : index
    %c0_31 = arith.constant 0 : index
    %90 = vector.load %arg2[%c0_30, %c0_31] : memref<8x128xf32, #tpu.memory_space<vmem>>, vector<8x128xf32>
    tpu.vector_store %arg2[%c0_30, %c0_31], %89 {strides = array<i32>} : memref<8x128xf32, #tpu.memory_space<vmem>>, vector<8x128xf32>,
    return
  }
}

</mosaic_0001>

<bundles_post_ra>
// kernel: _lambda_.1
= control target key start
LH: loop header
LB: loop body
LE: loop exit
PB: predicated region body
PF: predicated region fallthrough
CT: control target
= control target key end

     0   :  { %7 = vsyncpa [#allocation3], 0  ;;  %s622_s0 = inlined_call_operand.hbm [shape: f32[8,16], index: 0, kind: input, shape index: {}]   ;;  %s623_s1 = inlined_call_operand.hbm [shape: bf16[3,128,128], index: 1, kind: input, shape index: {}]   ;;  %s624_s2 = inlined_call_operand.vmem [shape: f32[8,128], index: 2, kind: output, shape index: {}]  }
   0x1   :  { %8 = vsyncpa [#allocation5], 0  ;;  %s556_s9 = smov [#allocation2]   ;;  %s557_s11 = smov [#allocation4]  }
   0x2   :  { %s15_s10 = sshll.u32 %s556_s9, 4  ;;  %s24_s12 = sshll.u32 %s557_s11, 4  ;;  %s16_s10 = int_to_ptr.vmem [resolvable:$true] %s15_s10  ;;  %s25_s12 = int_to_ptr.vmem [resolvable:$true] %s24_s12 }
   0x3   :  { %s520_s13 = scalar_lea.vmem %s16_s10, 128  ;;  %p525_p1 = scmp.lt.s32.totalorder %s16_s10, %s16_s10 }
   0x4   :  { %p521_p0 = scmp.ne.s32.totalorder %s16_s10, %s520_s13  ;;  %p526_p2 = scmp.lt.s32.totalorder %s520_s13, %s520_s13 }
   0x6   :  { %p527_p3 = por %p526_p2, %p525_p1 }
   0x8   :  { %p528_p4 = pnand %p527_p3, %p521_p0 }
   0xa   :  { %531 = shalt.err (!%p528_p4)
}
   0xb   :  { %18 = dma.hbm_to_vmem [thread:$0]  %s622_s0, 128, %s16_s10, [#allocation3]  }
   0xc   :  { %s540_s16 = scalar_lea.vmem %s25_s12, 3072  ;;  %p545_p6 = scmp.lt.s32.totalorder %s25_s12, %s25_s12 }
   0xd   :  { %p541_p5 = scmp.ne.s32.totalorder %s25_s12, %s540_s16  ;;  %p546_p7 = scmp.lt.s32.totalorder %s540_s16, %s540_s16 }
   0xf   :  { %p547_p8 = por %p546_p7, %p545_p6 }
  0x11   :  { %p548_p9 = pnand %p547_p8, %p541_p5 }
  0x13   :  { %551 = shalt.err (!%p548_p9)
}
  0x14   :  { %s558_s17 = smov 64   ;;  %s559_s18 = smov 4  }
  0x15   :  { %30 = dma.hbm_to_vmem [thread:$0]  %s623_s1, 3072, %s25_s12, [#allocation5], %s558_s17, %s558_s17, %s559_s18  }
  0x16   :  { %552 = dma.done.wait [#allocation3], 128  }
  0x17   :  { %553 = vsyncadd [#allocation3], 4294967168 }
  0x18   :  { %554 = dma.done.wait [#allocation5], 3072  }
  0x19   :  { %555 = vsyncadd [#allocation5], 4294964224  ;;  %v560_v0 = vmov 0.0   ;;  %vm561_vm0 = vmmov 0   ;;  %vm43_vm1 = vcmask 130048   ;;  %v487_v1 = vld [vmem:[#allocation4] sm:$0xff]   ;;  %v70_v36 = vlaneseq }
  0x1a   :  { %435 = vmatprep.subr.bf16.mxu0 %v560_v0  ;;  %437 = vmatprep.mubr.msk.bf16.mxu0 %vm561_vm0, %v560_v0  ;;  %v42_v2 = vld [vmem:[#allocation2] sm:$0xff]  ;;  %v489_v29 = vld [vmem:[#allocation4 + $0x70] sm:$0xff]   ;;  %v490_v30 = vld [vmem:[#allocation4 + $0x68] sm:$0xff]  }
  0x1b   :  { %441 = vmatprep.subr.bf16.mxu1 %v560_v0  ;;  %457 = vmatprep.mubr.msk.bf16.mxu1 %vm561_vm0, %v560_v0  ;;  %v44_v3 = vsel %vm43_vm1, %v42_v2, 0.0  ;;  %v53_v4 = vmul.f32 %v42_v2, %v42_v2  ;;  %v488_v28 = vld [vmem:[#allocation4 + $0x78] sm:$0xff]   ;;  %v491_v31 = vld [vmem:[#allocation4 + $0x60] sm:$0xff]   ;;  %v493_v33 = vld [vmem:[#allocation4 + $0x50] sm:$0xff]   ;;  %v602_v37 = vshrl.u32 %v70_v36, 7 }
  0x1c   :  { %436 = vmatpush3.bf16.msra.mxu0 %v487_v1  ;;  %v45_v5 = vrot.slane %v44_v3, 4  ;;  %442 = vmatpush3.bf16.msra.mxu1 %v488_v28  ;;  %v492_v32 = vld [vmem:[#allocation4 + $0x58] sm:$0xff]   ;;  %v494_v34 = vld [vmem:[#allocation4 + $0x48] sm:$0xff]   ;;  %v495_v35 = vld [vmem:[#allocation4 + $0x40] sm:$0xff]  }
  0x1d   :  { %461 = vmatprep.subr.bf16.mxu0 %v560_v0  ;;  %v54_v6 = vsel %vm43_vm1, %v53_v4, 0.0  ;;  %443 = vmatprep.subr.bf16.mxu1 %v560_v0  ;;  %v40_v38 = vld [vmem:[#allocation4 + $0x3c] sm:$0xf]  ;;  %v72_v40 = vsub.s32 5, %v602_v37 }
  0x1e   :  { %v46_v7 = vadd.f32 %v45_v5, %v44_v3  ;;  %v55_v8 = vrot.slane %v54_v6, 4  ;;  %v604_v39 = vunpack.c.l.bf16 %v40_v38 }
  0x20   :  { %v47_v9 = vrot.slane %v46_v7, 2  ;;  %v56_v10 = vadd.f32 %v55_v8, %v54_v6  ;;  %444 = vmatpush3.bf16.msra.mxu1 %v489_v29  ;;  %v73_v41 = vrot.slane %v604_v39, %v72_v40  ;;  %v496_v8 = vld [vmem:[#allocation4 + $0xb8] sm:$0xff]  }
  0x21   :  { %445 = vmatprep.subr.bf16.mxu1 %v560_v0 }
  0x22   :  { %v48_v11 = vadd.f32 %v47_v9, %v46_v7  ;;  %v57_v12 = vrot.slane %v56_v10, 2  ;;  %v497_v9 = vld [vmem:[#allocation4 + $0xb0] sm:$0xff]  }
  0x24   :  { %v49_v13 = vrot.slane %v48_v11, 1  ;;  %v58_v14 = vadd.f32 %v57_v12, %v56_v10  ;;  %446 = vmatpush3.bf16.msra.mxu1 %v490_v30  ;;  %v498_v10 = vld [vmem:[#allocation4 + $0xa8] sm:$0xff]   ;;  %v500_v12 = vld [vmem:[#allocation4 + $0x98] sm:$0xff]  }
  0x25   :  { %447 = vmatprep.subr.bf16.mxu1 %v560_v0 }
  0x26   :  { %v50_v15 = vadd.f32 %v49_v13, %v48_v11  ;;  %v59_v16 = vrot.slane %v58_v14, 1  ;;  %v499_v11 = vld [vmem:[#allocation4 + $0xa0] sm:$0xff]   ;;  %v501_v13 = vld [vmem:[#allocation4 + $0x90] sm:$0xff]  }
  0x28   :  { %v52_v17 = vmul.f32 0.125, %v50_v15  ;;  %v60_v18 = vadd.f32 %v59_v16, %v58_v14  ;;  %448 = vmatpush3.bf16.msra.mxu1 %v491_v31  ;;  %v502_v14 = vld [vmem:[#allocation4 + $0x88] sm:$0xff]   ;;  %v503_v15 = vld [vmem:[#allocation4 + $0x80] sm:$0xff]   ;;  %v166_v16 = vsub.s32 6, %v602_v37 }
  0x29   :  { %449 = vmatprep.subr.bf16.mxu1 %v560_v0 }
  0x2a   :  { %v61_v19 = vmul.f32 0.125, %v60_v18  ;;  %v62_v20 = vmul.f32 %v52_v17, %v52_v17  ;;  %v65_v24 = vsub.f32 %v42_v2, %v52_v17  ;;  %v167_v17 = vrot.slane %v604_v39, %v166_v16 }
  0x2c   :  { %v63_v21 = vsub.f32 %v61_v19, %v62_v20  ;;  %450 = vmatpush3.bf16.msra.mxu1 %v492_v32 }
  0x2d   :  { %451 = vmatprep.subr.bf16.mxu1 %v560_v0 }
  0x2e   :  { %v64_v22 = vmax.f32 %v63_v21, 0.0 }
  0x30   :  { %v66_v23 = vadd.f32 1e-05, %v64_v22  ;;  %452 = vmatpush3.bf16.msra.mxu1 %v493_v33 }
  0x31   :  { %453 = vmatprep.subr.bf16.mxu1 %v560_v0 }
  0x32   :  { %504 = vrsqrt.f32 %v66_v23 }
  0x34   :  { %454 = vmatpush3.bf16.msra.mxu1 %v494_v34 }
  0x35   :  { %455 = vmatprep.subr.bf16.mxu1 %v560_v0 }
  0x38   :  { %456 = vmatpush3.bf16.msra.mxu1 %v495_v35 }
  0x3f   :  { %v505_v25 = vpop.eup %504 }
  0x40   :  { %v68_v26 = vmul.f32 %v505_v25, %v65_v24 }
  0x42   :  { %v69_v27 = vpack.c.bf16 %v68_v26, %v68_v26 }
  0x44   :  { %438 = vmatmul.mubr.msk.bf16.vlgmr.msra.gmra.mxu0 %vm43_vm1, %v69_v27 }
  0x45   :  { %477 = vmatprep.mubr.msk.bf16.mxu0 %vm561_vm0, %v560_v0  ;;  %462 = vmatpush3.bf16.msra.mxu0 %v496_v8 }
  0x46   :  { %463 = vmatprep.subr.bf16.mxu0 %v560_v0 }
  0x49   :  { %464 = vmatpush3.bf16.msra.mxu0 %v497_v9 }
  0x4a   :  { %465 = vmatprep.subr.bf16.mxu0 %v560_v0 }
  0x4d   :  { %466 = vmatpush3.bf16.msra.mxu0 %v498_v10 }
  0x4e   :  { %467 = vmatprep.subr.bf16.mxu0 %v560_v0 }
  0x51   :  { %468 = vmatpush3.bf16.msra.mxu0 %v499_v11 }
  0x52   :  { %469 = vmatprep.subr.bf16.mxu0 %v560_v0 }
  0x55   :  { %470 = vmatpush3.bf16.msra.mxu0 %v500_v12 }
  0x56   :  { %471 = vmatprep.subr.bf16.mxu0 %v560_v0 }
  0x59   :  { %472 = vmatpush3.bf16.msra.mxu0 %v501_v13 }
  0x5a   :  { %473 = vmatprep.subr.bf16.mxu0 %v560_v0 }
  0x5d   :  { %474 = vmatpush3.bf16.msra.mxu0 %v502_v14 }
  0x5e   :  { %475 = vmatprep.subr.bf16.mxu0 %v560_v0 }
  0x61   :  { %476 = vmatpush3.bf16.msra.mxu0 %v503_v15 }
 0x104   :  { %v117_v42 = vpop.f32.mrf.mxu0 }
 0x105   :  { %v118_v43 = vadd.f32 %v117_v42, %v73_v41 }
 0x106   :  { %v439_v44 = vpop.f32.mrf.mxu0 }
 0x107   :  { %v123_v45 = vmax.f32 %v118_v43, 0.0 }
 0x108   :  { %v120_v46 = vpop.f32.mrf.mxu0 }
 0x109   :  { %v124_v47 = vrot.slane %v123_v45, 4  ;;  %v131_v48 = vmul.f32 %v123_v45, %v123_v45 }
 0x10a   :  { %v440_v49 = vpop.f32.mrf.mxu0 }
 0x10b   :  { %v125_v50 = vadd.f32 %v124_v47, %v123_v45  ;;  %v132_v51 = vrot.slane %v131_v48, 4 }
 0x10d   :  { %v126_v52 = vrot.slane %v125_v50, 2  ;;  %v133_v53 = vadd.f32 %v132_v51, %v131_v48  ;;  %v299_v48 = vsub.s32 7, %v602_v37 }
 0x10f   :  { %v134_v54 = vrot.slane %v133_v53, 2  ;;  %v127_v55 = vadd.f32 %v126_v52, %v125_v50  ;;  %v300_v49 = vrot.slane %v604_v39, %v299_v48 }
 0x111   :  { %v135_v56 = vadd.f32 %v134_v54, %v133_v53  ;;  %v128_v57 = vrot.slane %v127_v55, 1 }
 0x113   :  { %v136_v58 = vrot.slane %v135_v56, 1  ;;  %v129_v59 = vadd.f32 %v128_v57, %v127_v55 }
 0x115   :  { %v130_v60 = vmul.f32 0.125, %v129_v59  ;;  %v137_v61 = vadd.f32 %v136_v58, %v135_v56 }
 0x117   :  { %v138_v62 = vmul.f32 0.125, %v137_v61  ;;  %v139_v63 = vmul.f32 %v130_v60, %v130_v60  ;;  %v142_v4 = vsub.f32 %v123_v45, %v130_v60 }
 0x119   :  { %v140_v1 = vsub.f32 %v138_v62, %v139_v63 }
 0x11b   :  { %v141_v2 = vmax.f32 %v140_v1, 0.0 }
 0x11d   :  { %v143_v3 = vadd.f32 1e-05, %v141_v2 }
 0x11f   :  { %506 = vrsqrt.f32 %v143_v3 }
 0x12c   :  { %v507_v5 = vpop.eup %506 }
 0x12d   :  { %v145_v6 = vmul.f32 %v507_v5, %v142_v4 }
 0x12f   :  { %v146_v7 = vpack.c.bf16 %v145_v6, %v145_v6 }
 0x131   :  { %458 = vmatmul.mubr.bf16.vlgmr.msra.gmra.mxu1 %v146_v7 }
 0x1f1   :  { %v250_v18 = vpop.f32.mrf.mxu1 }
 0x1f2   :  { %v251_v19 = vadd.f32 %v250_v18, %v167_v17 }
 0x1f3   :  { %v459_v20 = vpop.f32.mrf.mxu1 }
 0x1f4   :  { %v256_v21 = vmax.f32 %v251_v19, 0.0 }
 0x1f5   :  { %v253_v22 = vpop.f32.mrf.mxu1 }
 0x1f6   :  { %v257_v23 = vrot.slane %v256_v21, 4  ;;  %v264_v24 = vmul.f32 %v256_v21, %v256_v21 }
 0x1f7   :  { %v460_v25 = vpop.f32.mrf.mxu1 }
 0x1f8   :  { %v258_v26 = vadd.f32 %v257_v23, %v256_v21  ;;  %v265_v27 = vrot.slane %v264_v24, 4 }
 0x1fa   :  { %v259_v28 = vrot.slane %v258_v26, 2  ;;  %v266_v29 = vadd.f32 %v265_v27, %v264_v24 }
 0x1fc   :  { %v260_v30 = vadd.f32 %v259_v28, %v258_v26  ;;  %v267_v31 = vrot.slane %v266_v29, 2 }
 0x1fe   :  { %v261_v0 = vrot.slane %v260_v30, 1  ;;  %v268_v32 = vadd.f32 %v267_v31, %v266_v29 }
 0x200   :  { %v262_v33 = vadd.f32 %v261_v0, %v260_v30  ;;  %v269_v34 = vrot.slane %v268_v32, 1 }
 0x202   :  { %v263_v35 = vmul.f32 0.125, %v262_v33  ;;  %v270_v36 = vadd.f32 %v269_v34, %v268_v32 }
 0x204   :  { %v271_v38 = vmul.f32 0.125, %v270_v36  ;;  %v272_v40 = vmul.f32 %v263_v35, %v263_v35  ;;  %v275_v44 = vsub.f32 %v256_v21, %v263_v35 }
 0x206   :  { %v273_v41 = vsub.f32 %v271_v38, %v272_v40 }
 0x208   :  { %v274_v42 = vmax.f32 %v273_v41, 0.0 }
 0x20a   :  { %v276_v43 = vadd.f32 1e-05, %v274_v42 }
 0x20c   :  { %508 = vrsqrt.f32 %v276_v43 }
 0x219   :  { %v509_v45 = vpop.eup %508 }
 0x21a   :  { %v278_v46 = vmul.f32 %v509_v45, %v275_v44 }
 0x21c   :  { %v279_v47 = vpack.c.bf16 %v278_v46, %v278_v46 }
 0x21e   :  { %478 = vmatmul.mubr.bf16.vlgmr.msra.gmra.mxu0 %v279_v47 }
 0x2de   :  { %v383_v50 = vpop.f32.mrf.mxu0 }
 0x2df   :  { %v384_v51 = vadd.f32 %v383_v50, %v300_v49 }
 0x2e0   :  { %v479_v52 = vpop.f32.mrf.mxu0 }
 0x2e1   :  { %510 = vtanh.f32 %v384_v51 }
 0x2e2   :  { %v386_v53 = vpop.f32.mrf.mxu0 }
 0x2e4   :  { %v480_v54 = vpop.f32.mrf.mxu0 }
 0x2ee   :  { %v511_v55 = vpop.eup %510 }
 0x2ef   :  { %390 = vst [vmem:[%s624_s2] sm:$0xff] %v511_v55 }
 0x2f0   :  { %395 = vsyncpa [#allocation3], 1 }
 0x2f1   :  { %396 = vsyncpa [#allocation5], 1 }

</bundles_post_ra>
